<compile_context>
chip_gen: v6e
topology: v6e:2x2x1
jax: 0.10.0
libtpu: 0.0.40
codegen_flags: <defaults>
</compile_context>

<pallas_src>
import functools

import jax
import jax.numpy as jnp
from jax.experimental import pallas as pl
from jax.experimental.pallas import tpu as pltpu

LANE = 128


def _round_up(v, m):
    return (v + m - 1) // m * m


def _vmem_limit_bytes():
    """Generation-aware VMEM budget (v7x: 64 MiB/TC, v5e/v6e: 128 MiB)."""
    try:
        info = pltpu.get_tpu_info()
        cap = int(getattr(info, "vmem_capacity_bytes", 0) or 0)
        if cap > 0:
            return max(32 << 20, min(112 << 20, cap * 7 // 8))
    except Exception:
        pass
    return 48 << 20  # conservative: fits every generation


def _choose_row_tile(n_p):
    # Prefer >= 2 row tiles so v7x's two TensorCores both get work on the
    # "parallel" axis; v5e/v6e (single TC) are unaffected.
    for t in (1024, 512, 256, 128):
        if n_p % t == 0 and n_p // t >= 2:
            return t
    half = n_p // 2
    if n_p % 2 == 0 and half % 8 == 0 and half >= 8:
        return half
    return n_p


def _choose_k_tile(n_p, tm, d, budget, z_resident):
    # Largest reduction tile whose double-buffered working set fits the budget.
    for t in (4096, 2048, 1024, 512, 256, 128):
        if n_p % t != 0:
            continue
        a_bytes = 2 * tm * t * 2                                # bf16 A, 2 bufs
        z_bytes = 2 * (n_p if z_resident else t) * d * 2        # bf16 z panel
        fixed = tm * d * 4 + 2 * tm * d * 4 + 2 * d * d * 2 + (1 << 16)
        if a_bytes + z_bytes + fixed <= budget:
            return t
    return 128


# ----------------------------------------------------------------------------
# Kernel 1: dense feature transform  O = X @ W1   (row-tiled, lane-dense out)
# ----------------------------------------------------------------------------
def transform_kernel(x_ref, w_ref, o_ref):
    o_ref[...] = jnp.dot(
        x_ref[...], w_ref[...], preferred_element_type=jnp.float32
    ).astype(o_ref.dtype)


def _transform(x, w, *, out_dtype, tm, vmem_limit):
    n_p, f = x.shape
    d = w.shape[1]
    return pl.pallas_call(
        transform_kernel,
        out_shape=jax.ShapeDtypeStruct((n_p, d), out_dtype),
        grid=(n_p // tm,),
        in_specs=[
            pl.BlockSpec((tm, f), lambda i: (i, 0)),
            pl.BlockSpec((f, d), lambda i: (0, 0)),
        ],
        out_specs=pl.BlockSpec((tm, d), lambda i: (i, 0)),
        compiler_params=pltpu.CompilerParams(
            dimension_semantics=("parallel",),
            vmem_limit_bytes=vmem_limit,
        ),
        cost_estimate=pl.CostEstimate(
            flops=2 * n_p * f * d,
            transcendentals=0,
            bytes_accessed=int(x.size * x.dtype.itemsize
                               + w.size * w.dtype.itemsize
                               + n_p * d * jnp.dtype(out_dtype).itemsize),
        ),
    )(x, w)


# ----------------------------------------------------------------------------
# Kernel 2 (fused layer 1 + layer-2 transform):
#   O = (relu(A_hat @ Z + b1) @ W2).astype(bf16)
#   grid = (rows "parallel", K-reduction "arbitrary"), f32 VMEM accumulator.
# ----------------------------------------------------------------------------
def agg_fused_kernel(a_ref, z_ref, b1_ref, w2_ref, o_ref, acc_ref, *,
                     tk, z_resident):
    k = pl.program_id(1)

    @pl.when(k == 0)
    def _():
        acc_ref[...] = jnp.zeros_like(acc_ref)

    if z_resident:
        z = z_ref[pl.ds(pl.multiple_of(k * tk, tk), tk), :]
    else:
        z = z_ref[...]
    acc_ref[...] += jnp.dot(a_ref[...], z, preferred_element_type=jnp.float32)

    @pl.when(k == pl.num_programs(1) - 1)
    def _():
        h = jnp.maximum(acc_ref[...] + b1_ref[...], 0.0)
        o_ref[...] = jnp.dot(
            h.astype(w2_ref.dtype), w2_ref[...],
            preferred_element_type=jnp.float32,
        ).astype(o_ref.dtype)


def _aggregate_fused(a, z, b1, w2, *, tm, tk, z_resident, vmem_limit):
    n_p = a.shape[0]
    d = z.shape[1]
    c = w2.shape[1]
    if z_resident:
        z_spec = pl.BlockSpec((n_p, d), lambda i, k: (0, 0))   # resident panel
    else:
        z_spec = pl.BlockSpec((tk, d), lambda i, k: (k, 0))    # streamed per-k
    kernel = functools.partial(agg_fused_kernel, tk=tk, z_resident=z_resident)
    return pl.pallas_call(
        kernel,
        out_shape=jax.ShapeDtypeStruct((n_p, c), jnp.bfloat16),
        grid=(n_p // tm, n_p // tk),
        in_specs=[
            pl.BlockSpec((tm, tk), lambda i, k: (i, k)),   # A_hat row/col tile
            z_spec,                                        # X @ W1 panel
            pl.BlockSpec((1, d), lambda i, k: (0, 0)),     # b1 (lane-padded)
            pl.BlockSpec((d, c), lambda i, k: (0, 0)),     # W2 (resident, 32 KB)
        ],
        out_specs=pl.BlockSpec((tm, c), lambda i, k: (i, 0)),
        scratch_shapes=[pltpu.VMEM((tm, d), jnp.float32)],
        compiler_params=pltpu.CompilerParams(
            dimension_semantics=("parallel", "arbitrary"),
            vmem_limit_bytes=vmem_limit,
        ),
        cost_estimate=pl.CostEstimate(
            flops=2 * n_p * n_p * d + 2 * n_p * d * c,
            transcendentals=0,
            bytes_accessed=int(a.size * a.dtype.itemsize
                               + (1 if z_resident else n_p // tm)
                               * z.size * z.dtype.itemsize
                               + n_p * c * 2),
        ),
    )(a, z, b1, w2)


# ----------------------------------------------------------------------------
# Kernel 3 (final layer): O = A_hat @ Z + b2  in f32, accumulating directly
# into the resident output block (no scratch, no finalize copy).
# ----------------------------------------------------------------------------
def agg_bias_kernel(a_ref, z_ref, b_ref, o_ref, *, tk, z_resident):
    k = pl.program_id(1)

    @pl.when(k == 0)
    def _():
        o_ref[...] = jnp.zeros_like(o_ref)

    if z_resident:
        z = z_ref[pl.ds(pl.multiple_of(k * tk, tk), tk), :]
    else:
        z = z_ref[...]
    o_ref[...] += jnp.dot(a_ref[...], z, preferred_element_type=jnp.float32)

    @pl.when(k == pl.num_programs(1) - 1)
    def _():
        o_ref[...] += b_ref[...]


def _aggregate_bias(a, z, b, *, tm, tk, z_resident, vmem_limit):
    n_p = a.shape[0]
    d = z.shape[1]
    if z_resident:
        z_spec = pl.BlockSpec((n_p, d), lambda i, k: (0, 0))
    else:
        z_spec = pl.BlockSpec((tk, d), lambda i, k: (k, 0))
    kernel = functools.partial(agg_bias_kernel, tk=tk, z_resident=z_resident)
    return pl.pallas_call(
        kernel,
        out_shape=jax.ShapeDtypeStruct((n_p, d), jnp.float32),
        grid=(n_p // tm, n_p // tk),
        in_specs=[
            pl.BlockSpec((tm, tk), lambda i, k: (i, k)),   # A_hat row/col tile
            z_spec,                                        # hw2 panel
            pl.BlockSpec((1, d), lambda i, k: (0, 0)),     # b2 (lane-padded)
        ],
        out_specs=pl.BlockSpec((tm, d), lambda i, k: (i, 0)),
        compiler_params=pltpu.CompilerParams(
            dimension_semantics=("parallel", "arbitrary"),
            vmem_limit_bytes=vmem_limit,
        ),
        cost_estimate=pl.CostEstimate(
            flops=2 * n_p * n_p * d,
            transcendentals=0,
            bytes_accessed=int(a.size * a.dtype.itemsize
                               + (1 if z_resident else n_p // tm)
                               * z.size * z.dtype.itemsize
                               + n_p * d * 4),
        ),
    )(a, z, b)


# ----------------------------------------------------------------------------
# Forward pass
# ----------------------------------------------------------------------------
def gcn_forward(x, edge_index, w1, b1, w2, b2):
    """x: [N, F] float32, edge_index: [2, E] int32 (directed edges src->dst)."""
    n, f = x.shape
    h = w1.shape[1]
    c = w2.shape[1]

    # --- glue: dense normalized adjacency (PyG gcn_norm, source_to_target) ---
    # TODO(synk): for realistically sparse graphs, block-sparse skipping of
    #             zero A_hat tiles (scalar-prefetch remapped index_map) / CSR
    #             gather would avoid materializing the dense N x N matrix.
    src, dst = edge_index[0], edge_index[1]
    adj = jnp.zeros((n, n), dtype=jnp.float32)
    # out[dst] += x[src]  =>  A[dst, src]; duplicate edges are scatter-summed.
    adj = adj.at[dst, src].add(1.0)
    idx = jnp.arange(n)
    diag = jnp.diagonal(adj)
    # add_remaining_self_loops: keep existing self-loop weight, else add 1.
    adj = adj.at[idx, idx].set(jnp.where(diag > 0, diag, 1.0))
    deg = adj.sum(axis=1)
    dinv = jnp.where(deg > 0, 1.0 / jnp.sqrt(deg), 0.0)
    a_hat = dinv[:, None] * adj * dinv[None, :]          # D^-1/2 (A+I) D^-1/2

    # --- pad to TPU-friendly, lane-dense shapes (bf16 streams, f32 biases) ---
    n_p = max(_round_up(n, LANE), LANE)
    h_p = _round_up(h, LANE)
    c_p = _round_up(c, LANE)

    a_hat_p = (jnp.zeros((n_p, n_p), jnp.bfloat16)
               .at[:n, :n].set(a_hat.astype(jnp.bfloat16)))
    x_p = jnp.zeros((n_p, f), jnp.bfloat16).at[:n, :].set(x.astype(jnp.bfloat16))
    w1_p = jnp.zeros((f, h_p), jnp.bfloat16).at[:, :h].set(w1.astype(jnp.bfloat16))
    b1_p = jnp.zeros((1, h_p), jnp.float32).at[0, :h].set(b1)
    w2_p = jnp.zeros((h_p, c_p), jnp.bfloat16).at[:h, :c].set(w2.astype(jnp.bfloat16))
    b2_p = jnp.zeros((1, c_p), jnp.float32).at[0, :c].set(b2)

    # --- tiling: generation-aware VMEM budget, big tiles, >=2 row tiles ------
    vmem_limit = _vmem_limit_bytes()
    budget = int(vmem_limit * 0.6)
    d = h_p  # both z panels (xw1, hw2) are 128 lanes wide
    z_resident = (2 * n_p * d * 2) <= (budget // 4)
    tm = _choose_row_tile(n_p)
    tk = _choose_k_tile(n_p, tm, d, budget, z_resident)

    # ---- layer 1 + fused layer-2 transform:
    #      xw1 = X @ W1 (bf16), then hw2 = relu(A_hat @ xw1 + b1) @ W2 (bf16)
    xw1 = _transform(x_p, w1_p, out_dtype=jnp.bfloat16, tm=tm,
                     vmem_limit=vmem_limit)                        # [Np, Hp]
    hw2 = _aggregate_fused(a_hat_p, xw1, b1_p, w2_p, tm=tm, tk=tk,
                           z_resident=z_resident, vmem_limit=vmem_limit)

    # TODO(synk): training-mode dropout (scaled Bernoulli mask via pltpu PRNG)
    #             not applied; forward matches eval/inference mode.

    # ---- layer 2 aggregation: out = A_hat @ hw2 + b2 ----
    out = _aggregate_bias(a_hat_p, hw2, b2_p, tm=tm, tk=tk,
                          z_resident=z_resident, vmem_limit=vmem_limit)

    return out[:n, :c]


# ----------------------------------------------------------------------------
# Plain-JAX reference (f32) for a sanity check.
# ----------------------------------------------------------------------------
def gcn_reference(x, edge_index, w1, b1, w2, b2):
    n = x.shape[0]
    src, dst = edge_index[0], edge_index[1]
    adj = jnp.zeros((n, n), dtype=jnp.float32)
    adj = adj.at[dst, src].add(1.0)
    idx = jnp.arange(n)
    diag = jnp.diagonal(adj)
    adj = adj.at[idx, idx].set(jnp.where(diag > 0, diag, 1.0))
    deg = adj.sum(axis=1)
    dinv = jnp.where(deg > 0, 1.0 / jnp.sqrt(deg), 0.0)
    a_hat = dinv[:, None] * adj * dinv[None, :]
    h = jnp.maximum(a_hat @ (x @ w1) + b1[None, :], 0.0)
    return a_hat @ (h @ w2) + b2[None, :]


if __name__ == "__main__":
    # Small shapes consistent with the module: N nodes, num_features, hidden, classes.
    N, F, H, C = 16, 8, 32, 4
    E = 40

    key = jax.random.PRNGKey(0)
    k_x, k_e1, k_e2, k_w1, k_b1, k_w2, k_b2 = jax.random.split(key, 7)

    x = jax.random.normal(k_x, (N, F), dtype=jnp.float32)
    src = jax.random.randint(k_e1, (E,), 0, N, dtype=jnp.int32)
    dst = jax.random.randint(k_e2, (E,), 0, N, dtype=jnp.int32)
    edge_index = jnp.stack([src, dst], axis=0)               # [2, E]

    # Deterministic parameter init (Glorot-ish scaling).
    w1 = jax.random.normal(k_w1, (F, H), dtype=jnp.float32) * (1.0 / jnp.sqrt(F))
    b1 = jnp.zeros((H,), dtype=jnp.float32)
    w2 = jax.random.normal(k_w2, (H, C), dtype=jnp.float32) * (1.0 / jnp.sqrt(H))
    b2 = jnp.zeros((C,), dtype=jnp.float32)

    out = gcn_forward(x, edge_index, w1, b1, w2, b2)
    jax.block_until_ready(out)
    assert out.shape == (N, C)

    ref = gcn_reference(x, edge_index, w1, b1, w2, b2)
    max_err = float(jnp.max(jnp.abs(out - ref)))
    assert max_err < 0.1, f"max abs error vs f32 reference too large: {max_err}"

    print("KERNEL_OK")
</pallas_src>

<mosaic_0001>
module attributes {stable_mosaic.version = 11 : i64} {
  func.func @transform_kernel(%arg0: i32, %arg1: memref<64x8xbf16, #tpu.memory_space<vmem>>, %arg2: memref<8x128xbf16, #tpu.memory_space<vmem>>, %arg3: memref<64x128xbf16, #tpu.memory_space<vmem>>) attributes {dimension_semantics = [#tpu.dimension_semantics<parallel>], iteration_bounds = array<i64: 2>, scalar_prefetch = 0 : i64, scratch_operands = 0 : i64, tpu.core_type = #tpu.core_type<tc>, window_params = [{transform_indices = @transform_0, window_bounds = array<i64: 64, 8>}, {pipeline_mode = #tpu.pipeline_mode<synchronous>, transform_indices = @transform_1, window_bounds = array<i64: 8, 128>}, {transform_indices = @transform_2, window_bounds = array<i64: 64, 128>}]} {
    %c0 = arith.constant 0 : index
    %c0_0 = arith.constant 0 : index
    %0 = vector.load %arg1[%c0, %c0_0] : memref<64x8xbf16, #tpu.memory_space<vmem>>, vector<64x8xbf16>
    %c0_1 = arith.constant 0 : index
    %c0_2 = arith.constant 0 : index
    %1 = vector.load %arg2[%c0_1, %c0_2] : memref<8x128xbf16, #tpu.memory_space<vmem>>, vector<8x128xbf16>
    %cst = arith.constant dense<0.000000e+00> : vector<64x128xf32>
    %2 = tpu.matmul %0, %1, %cst {dimension_numbers = #tpu.dot_dimension_numbers<[1], [0], [0], [1], [0, 0, 1, 1], [], []>} : vector<64x8xbf16>, vector<8x128xbf16>, vector<64x128xf32> -> vector<64x128xf32>
    %3 = arith.truncf %2 : vector<64x128xf32> to vector<64x128xbf16>
    %c0_3 = arith.constant 0 : index
    %c0_4 = arith.constant 0 : index
    %4 = vector.load %arg3[%c0_3, %c0_4] : memref<64x128xbf16, #tpu.memory_space<vmem>>, vector<64x128xbf16>
    tpu.vector_store %arg3[%c0_3, %c0_4], %3 {strides = array<i32>} : memref<64x128xbf16, #tpu.memory_space<vmem>>, vector<64x128xbf16>,
    return
  }
  func.func @transform_0(%arg0: i32) -> (i32, i32) {
    %c0_i32 = arith.constant 0 : i32
    %c0_i32_0 = arith.constant 0 : i32
    return %arg0, %c0_i32 : i32, i32
  }
  func.func @transform_1(%arg0: i32) -> (i32, i32) {
    %c0_i32 = arith.constant 0 : i32
    %c0_i32_0 = arith.constant 0 : i32
    %c0_i32_1 = arith.constant 0 : i32
    return %c0_i32, %c0_i32_0 : i32, i32
  }
  func.func @transform_2(%arg0: i32) -> (i32, i32) {
    %c0_i32 = arith.constant 0 : i32
    %c0_i32_0 = arith.constant 0 : i32
    return %arg0, %c0_i32 : i32, i32
  }
}

</mosaic_0001>

<bundles_post_ra>
// kernel: tpu_custom_call.1
= control target key start
LH: loop header
LB: loop body
LE: loop exit
PB: predicated region body
PF: predicated region fallthrough
CT: control target
= control target key end

     0   :  { %7 = vsyncpa [#allocation3], 0  ;;  %s681_s0 = inlined_call_operand.vmem [shape: bf16[128,8], index: 0, kind: input, shape index: {}]   ;;  %s682_s1 = inlined_call_operand.vmem [shape: bf16[8,128], index: 1, kind: input, shape index: {}]   ;;  %s683_s2 = inlined_call_operand.hbm [shape: bf16[128,128], index: 2, kind: output, shape index: {}]  }
   0x1   :  { %9 = vsyncpa [#allocation3 + $0x1], 0  ;;  %s577_s9 = smov 0   ;;  %s579_s10 = smov 0  }
   0x2   :  { %s581_s11 = smov 0   ;;  %s583_s12 = smov 0  }
   0x3 LB: > { %s598_s13 = sadd.s32 4294967295, %s557_s12   ;;  %s373_s14 = sadd.s32 4294967294, %s557_s12   ;;  %s557_s12 = sphi %s583_s12, %s689_s12   ;;  %s553_s11 = sphi %s581_s11, %s688_s11   ;;  %s549_s10 = sphi %s579_s10, %s687_s10   ;;  %s545_s9 = sphi %s577_s9, %s686_s9  }
   0x4   : > { %s602_s15 = sadd.s32 1, %s557_s12   ;;  %s69_s16 = sadd.s32 1, %s553_s11 }
   0x5   : > { %s66_s17 = ssub.s32 %s557_s12, %s602_s15  ;;  %p79_p0 = scmp.ne.s32.totalorder %s553_s11, %s549_s10 }
   0x6   : > { %p67_p1 = scmp.eq.s32.totalorder %s66_s17, 0  ;;  %p80_p2 = scmp.eq.s32.totalorder %s598_s13, 1 }
   0x7   : > { %p85_p3 = scmp.ne.s32.totalorder %s549_s10, %s545_s9  ;;  %p86_p4 = scmp.eq.s32.totalorder %s373_s14, 1 }
   0x8   : > { %s613_s18 = scalar_select %p67_p1, %s553_s11, %s69_s16  }
   0x9   : > { %p615_p5 = por %p80_p2, %p79_p0  ;;  %p619_p6 = por %p86_p4, %p85_p3 }
   0xa   : > { %p376_p7 = scmp.ge.s32.totalorder %s557_s12, 1  ;;  %p116_p8 = scmp.lt.s32.totalorder %s557_s12, 3 }
   0xc   : > { %p117_p9 = pnand %p376_p7, %p116_p8 }
   0xd   : > { %s378_s23 = sshll.u32 (!%p117_p9), %s598_s13, 3  ;;  %s135_s28 = sand.u32 (!%p117_p9), 1, %s549_s10  }
   0xe   : > { %120 = sbr.rel (%p117_p9) target bundleno = 239 (0xef), region = 28  ;;  %p139_p10 = scmp.lt.s32.totalorder (!%p117_p9), %s378_s23, 15 }
   0xf   : > { %s377_s29 = sshll.u32 (!%p117_p9), %s135_s28, 5  ;;  %s409_s4 = sshll.u32 (!%p117_p9), %s598_s13, 9 }
  0x10   : > { %s137_s30 = scalar_lea.vmem (!%p117_p9), [#allocation2], %s377_s29  ;;  %s639_s7 = scalar_lea.hbm (!%p117_p9), %s683_s2, %s409_s4 }
  0x11   : > { %s311_s3 = sshll.u32 (!%p117_p9), %s137_s30, 4  ;;  %s641_s8 = scalar_lea.sflag (!%p117_p9), [#allocation3], %s135_s28  ;;  %s634_s3 = int_to_ptr.vmem [resolvable:$true] %s311_s3 }
  0x12   : > { %s497_s13 = scalar_lea.vmem (!%p117_p9), %s634_s3, 512  ;;  %s559_s14 = smov (!%p117_p9), [#allocation2]  }
  0x13   : > { %v154_v0 = vld [vmem:[%s682_s1] sm:$0xf]  ;;  %vm188_vm0 = vcmask 1043456   ;;  %s691_s23 = smov (!%p139_p10, %s378_s23), 15  ;;  %vm175_vm1 = vcmask 64512   ;;  %p498_p11 = scmp.ne.s32.totalorder %s634_s3, %s497_s13 }
  0x14   : > { %450 = vmatprep.subr.msk.bf16.mxu0 %vm188_vm0, %v154_v0  ;;  %451 = vmatprep.subr.msk.bf16.mxu1 %vm188_vm0, %v154_v0  ;;  %v190_v1 = vsel %vm188_vm0, %v154_v0, 0  ;;  %s379_s24 = sshll.u32 %s691_s23, 2  ;;  %s501_s16 = sshll.u32 %s559_s14, 4  ;;  %s502_s16 = int_to_ptr.vmem [resolvable:$false] %s501_s16 }
  0x15   : > { %439 = vmatpush3.bf16.msra.mxu0 %v190_v1  ;;  %449 = vmatpush3.bf16.msra.mxu1 %v190_v1  ;;  %s142_s27 = scalar_lea.vmem %s681_s0, %s379_s24  ;;  %p499_p12 = pnand %p498_p11, %p615_p5 }
  0x16   : > { %v493_v2 = vld [vmem:[%s142_s27] sm:$0xff]   ;;  %v494_v3 = vld [vmem:[%s142_s27 + $0x10] sm:$0xff]   ;;  %v495_v4 = vld [vmem:[%s142_s27 + $0x8] sm:$0xff]   ;;  %s503_s17 = scalar_lea.vmem %s502_s16, 1024  ;;  %p504_p0 = scmp.lt.s32.totalorder %s634_s3, %s502_s16 }
  0x17   : > { %440 = vmatprep.mubr.msk.bf16.mxu0 %vm175_vm1, %v493_v2  ;;  %444 = vmatprep.mubr.msk.bf16.mxu1 %vm175_vm1, %v494_v3  ;;  %v496_v5 = vld [vmem:[%s142_s27 + $0x18] sm:$0xff]   ;;  %p500_p13 = pneg %p499_p12  ;;  %p505_p1 = scmp.lt.s32.totalorder %s503_s17, %s497_s13 }
  0x18   : > { %441 = vmatmul.mubr.msk.bf16.vlgmr.msra.gmra.mxu0 %vm175_vm1, %v495_v4  ;;  %445 = vmatmul.mubr.msk.bf16.vlgmr.msra.gmra.mxu1 %vm175_vm1, %v496_v5 }
  0x19   : > { %p506_p2 = por %p505_p1, %p504_p0 }
  0x1b   : > { %p507_p3 = pnand %p506_p2, %p500_p13 }
  0xd8   : > { %v442_v6 = vpop.f32.mrf.mxu0  ;;  %v446_v7 = vpop.f32.mrf.mxu1 }
  0xda   : > { %v226_v8 = vpop.f32.mrf.mxu0  ;;  %v242_v9 = vpop.f32.mrf.mxu1 }
  0xdc   : > { %v443_v10 = vpop.f32.mrf.mxu0  ;;  %v447_v12 = vpop.f32.mrf.mxu1 }
  0xdd   : > { %v418_v11 = vpack.c.bf16 %v443_v10, %v442_v6  ;;  %v428_v13 = vpack.c.bf16 %v447_v12, %v446_v7 }
  0xde   : > { %v229_v14 = vpop.f32.mrf.mxu0  ;;  %v245_v16 = vpop.f32.mrf.mxu1 }
  0xdf   : > { %430 = vst [vmem:[%s137_s30 + $0x8] sm:$0xff] %v418_v11   ;;  %v413_v15 = vpack.c.bf16 %v229_v14, %v226_v8  ;;  %432 = vst [vmem:[%s137_s30 + $0x18] sm:$0xff] %v428_v13   ;;  %v423_v17 = vpack.c.bf16 %v245_v16, %v242_v9 }
  0xe1   : > { %414 = vst [vmem:[%s137_s30] sm:$0xff] %v413_v15   ;;  %431 = vst [vmem:[%s137_s30 + $0x10] sm:$0xff] %v423_v17  }
  0xe2   : > { %510 = shalt.err (!%p507_p3)
}
  0xe3   : > { %s511_s21 = scalar_lea.hbm %s639_s7, 512  ;;  %s515_s24 = scalar_lea.hbm %s683_s2, 1024 }
  0xe4   : > { %p512_p4 = scmp.ne.s32.totalorder %s639_s7, %s511_s21  ;;  %p516_p9 = scmp.lt.s32.totalorder %s639_s7, %s683_s2 }
  0xe5   : > { %p517_p10 = scmp.lt.s32.totalorder %s515_s24, %s511_s21 }
  0xe6   : > { %p513_p7 = pnand %p512_p4, %p615_p5 }
  0xe7   : > { %p518_p11 = por %p517_p10, %p516_p9 }
  0xe8   : > { %p514_p8 = pneg %p513_p7 }
  0xea   : > { %p519_p12 = pnand %p518_p11, %p514_p8 }
  0xec   : > { %522 = shalt.err (!%p519_p12)
}
  0xed   : > { %s560_s27 = smov 64   ;;  %s561_s28 = smov 4  }
  0xee   : > { %452 = dma.vmem_to_hbm [thread:$0]  (%p615_p5), %s634_s3, 512, %s639_s7, %s641_s8, %s560_s27, %s560_s27, %s561_s28  }
  0xef PF: > { %p458_p13 = scmp.ge.s32.totalorder %s557_s12, 2  ;;  %s326_s29 = sand.u32 1, %s545_s9  }
  0xf0   : > { %s327_s30 = scalar_lea.sflag [#allocation3], %s326_s29 }
  0xf1   : > { %p455_p0 = pnand %p458_p13, %p619_p6 }
  0xf3   : > { %p456_p1 = pneg %p455_p0 }
  0xf5   : > { %540 = dma.done.wait (%p456_p1), %s327_s30, 512  }
  0xf6   : > { %542 = vsyncadd (%p456_p1), %s327_s30, 4294966784  ;;  %p12_p2 = scmp.ge.s32.totalorder %s602_s15, 4   ;;  %s686_s9 = smov %s549_s10 }
  0xf7   : > { %s687_s10 = smov %s553_s11  ;;  %s688_s11 = smov %s613_s18 }
  0xf8   : > { %s689_s12 = smov %s602_s15  ;;  %14 = sbr.rel (!%p12_p2) target bundleno = 3 (0x3), region = 63 }
  0xfd   :  { %332 = vsyncpa [#allocation3], 1 }
  0xfe   :  { %334 = vsyncpa [#allocation3 + $0x1], 1 }

</bundles_post_ra>
